<compile_context>
chip_gen: v6e
topology: v6e:2x2x1
jax: 0.10.0
libtpu: 0.0.40
codegen_flags: <defaults>
</compile_context>

<pallas_src>
import functools

import jax
import jax.numpy as jnp
from jax.experimental import pallas as pl
from jax.experimental.pallas import tpu as pltpu

LANE = 128


def _round_up(x, m):
    return ((x + m - 1) // m) * m


def _maybe_pad2(x, rows, cols, dtype):
    """Cast / zero-pad a 2-D array only if actually needed (avoids an extra
    full HBM rewrite of the biggest operand when it is already aligned)."""
    if x.dtype != dtype:
        x = x.astype(dtype)
    r, c = x.shape
    if r == rows and c == cols:
        return x
    return jnp.pad(x, ((0, rows - r), (0, cols - c)))


def _tpu_vmem_capacity():
    try:
        return int(pltpu.get_tpu_info().vmem_capacity_bytes)
    except Exception:
        return 64 << 20  # conservative fallback (v7x per-core VMEM)


def _vmem_limit(footprint_bytes, capacity):
    # Explicit scoped-VMEM request: actual footprint + headroom, capped at
    # ~75% of the physical per-core capacity (≈96 MiB on v5e/v6e, ≈48 MiB v7x).
    limit = max(footprint_bytes + (4 << 20), 32 << 20)
    return int(min(limit, int(0.75 * capacity)))


# --------------------------- pass 0: S = X @ W ------------------------------
def _support_kernel(feat_ref, w_ref, s_ref):
    # Tiny matmul: Fin fits in one K block for typical GCN widths.
    # TODO(synk): add K-tiling here for very large in_features_dim.
    s_ref[...] = jnp.dot(feat_ref[...], w_ref[...],
                         preferred_element_type=jnp.float32).astype(s_ref.dtype)


# --------------------- pass 1: Y = A @ S  + BN moments ----------------------
def _agg_stats_kernel(adj_ref, s_ref, y_ref, sum_ref, sq_ref,
                      *, n_valid, tm, tk):
    """Row tile i, K tile k: accumulate Y[i] += adj[i,k] @ S[k] directly in the
    (resident) output block.  At the last K step emit row-masked BatchNorm
    partial moments (sum, sum of squares) for this row tile."""
    i = pl.program_id(0)
    k = pl.program_id(1)

    @pl.when(k == 0)
    def _():
        y_ref[...] = jnp.zeros_like(y_ref)

    koff = pl.multiple_of(k * tk, LANE)
    y_ref[...] += jnp.dot(adj_ref[...], s_ref[pl.ds(koff, tk), :],
                          preferred_element_type=jnp.float32)

    @pl.when(k == pl.num_programs(1) - 1)
    def _():
        y = y_ref[...]
        # Exclude zero-padded rows (>= n_valid) from the batch statistics.
        row_ids = i * tm + jax.lax.broadcasted_iota(jnp.int32, (tm, 1), 0)
        mask = (row_ids < n_valid).astype(jnp.float32)
        ym = y * mask
        sum_ref[...] = jnp.broadcast_to(jnp.sum(ym, axis=0, keepdims=True),
                                        sum_ref.shape)
        sq_ref[...] = jnp.broadcast_to(jnp.sum(ym * y, axis=0, keepdims=True),
                                       sq_ref.shape)


# ------------------- pass 2: streaming BN-affine + activation ---------------
def _bn_act_kernel(y_ref, scale_ref, shift_ref, out_ref, *, active, activation):
    y = y_ref[...].astype(jnp.float32) * scale_ref[...] + shift_ref[...]
    if active:
        if activation == 'relu':
            y = jnp.maximum(y, 0.0)
        elif activation == 'sigmoid':
            y = jax.nn.sigmoid(y)
        elif activation == 'tanh':
            y = jnp.tanh(y)
        elif activation == 'leakyrelu':
            y = jnp.where(y >= 0.0, y, 0.2 * y)   # nn.LeakyReLU(0.2)
        else:
            raise ValueError('Unknown activation type %s' % activation)
    out_ref[...] = y.astype(out_ref.dtype)


def gnn_layer_forward(features, adj, weight, bias=None, *,
                      use_bias=True, batchnorm=True, active=True,
                      activation='relu', eps=1e-5, mxu_bf16=False):
    N, Fin = features.shape
    Fout = weight.shape[1]

    vmem_cap = _tpu_vmem_capacity()
    # Generation-aware aggregation tile: bigger on 128-MiB-VMEM v5e/v6e,
    # 512 on v7x (64 MiB).  Node dim is padded up to a multiple of the tile
    # instead of letting the tile collapse to 128.
    t_cap = 1024 if vmem_cap >= (96 << 20) else 512
    T = min(t_cap, _round_up(N, LANE))
    n_p = _round_up(N, T)
    fin_p = _round_up(Fin, LANE)
    fout_p = _round_up(Fout, LANE)
    nr = n_p // T
    nk = n_p // T

    mxu_dtype = jnp.bfloat16 if mxu_bf16 else jnp.float32
    bpe = 2 if mxu_bf16 else 4

    feat_p = _maybe_pad2(features, n_p, fin_p, jnp.float32)
    w_p = _maybe_pad2(weight, fin_p, fout_p, jnp.float32)
    adj_p = _maybe_pad2(adj, n_p, n_p, mxu_dtype)

    # ----------------------- pass 0: S = X @ W ------------------------------
    vmem0 = _vmem_limit(2 * T * fin_p * 4 + 2 * fin_p * fout_p * 4
                        + 2 * T * fout_p * bpe, vmem_cap)
    support = pl.pallas_call(
        _support_kernel,
        out_shape=jax.ShapeDtypeStruct((n_p, fout_p), mxu_dtype),
        grid=(nr,),
        in_specs=[
            pl.BlockSpec((T, fin_p), lambda i: (i, 0)),
            pl.BlockSpec((fin_p, fout_p), lambda i: (0, 0)),
        ],
        out_specs=pl.BlockSpec((T, fout_p), lambda i: (i, 0)),
        compiler_params=pltpu.CompilerParams(
            dimension_semantics=("parallel",), vmem_limit_bytes=vmem0),
        cost_estimate=pl.CostEstimate(
            flops=2 * n_p * fin_p * fout_p, transcendentals=0,
            bytes_accessed=(n_p * fin_p + fin_p * fout_p) * 4
                           + n_p * fout_p * bpe),
    )(feat_p, w_p)

    # --------------- pass 1: Y = A @ S with fused BN moments ----------------
    kernel1 = functools.partial(_agg_stats_kernel, n_valid=N, tm=T, tk=T)
    vmem1 = _vmem_limit(2 * T * T * bpe            # adj tile (double-buffered)
                        + 2 * n_p * fout_p * bpe   # S (VMEM-resident)
                        + 2 * T * fout_p * 4       # Y output tile
                        + 4 * 8 * fout_p * 4,      # stats tiles
                        vmem_cap)
    y, psum, psq = pl.pallas_call(
        kernel1,
        out_shape=(
            jax.ShapeDtypeStruct((n_p, fout_p), jnp.float32),
            jax.ShapeDtypeStruct((nr * 8, fout_p), jnp.float32),
            jax.ShapeDtypeStruct((nr * 8, fout_p), jnp.float32),
        ),
        grid=(nr, nk),
        in_specs=[
            # TODO(synk): for genuinely sparse adj (torch.spmm), drive this
            # index_map with scalar-prefetched CSR block offsets to skip
            # all-zero tiles instead of the dense (T, T) stream.
            pl.BlockSpec((T, T), lambda i, k: (i, k)),            # adj tile
            pl.BlockSpec((n_p, fout_p), lambda i, k: (0, 0)),     # S, resident
        ],
        out_specs=[
            pl.BlockSpec((T, fout_p), lambda i, k: (i, 0)),       # pre-BN output
            pl.BlockSpec((8, fout_p), lambda i, k: (i, 0)),       # partial sum
            pl.BlockSpec((8, fout_p), lambda i, k: (i, 0)),       # partial sum sq
        ],
        compiler_params=pltpu.CompilerParams(
            dimension_semantics=("parallel", "arbitrary"),
            vmem_limit_bytes=vmem1),
        cost_estimate=pl.CostEstimate(
            flops=2 * n_p * n_p * fout_p, transcendentals=0,
            bytes_accessed=n_p * n_p * bpe + n_p * fout_p * bpe
                           + n_p * fout_p * 4 + 2 * nr * 8 * fout_p * 4),
    )(adj_p, support)

    # ----- tiny device-side reduction of partial moments -> scale / shift ----
    if batchnorm:
        s = jnp.sum(psum.reshape(nr, 8, fout_p)[:, 0, :], axis=0)
        sq = jnp.sum(psq.reshape(nr, 8, fout_p)[:, 0, :], axis=0)
        mean = s / N
        var = sq / N - mean * mean          # biased variance (training-mode BN)
        scale = jax.lax.rsqrt(var + eps)    # gamma = 1
        shift = -mean * scale               # beta = 0; pre-BN bias cancels
    else:
        scale = jnp.ones((fout_p,), jnp.float32)
        if use_bias and bias is not None:
            shift = jnp.pad(bias.astype(jnp.float32), (0, fout_p - Fout))
        else:
            shift = jnp.zeros((fout_p,), jnp.float32)

    if (not batchnorm) and (not active) and not (use_bias and bias is not None):
        return y[:N, :Fout]

    # ------------- pass 2: BN-affine + activation (large row block) ---------
    tm2 = T
    for m in (16, 8, 4, 2):
        if nr % m == 0 and 4 * (T * m) * fout_p * 4 <= (24 << 20):
            tm2 = T * m
            break
    nr2 = n_p // tm2
    kernel2 = functools.partial(_bn_act_kernel, active=active,
                                activation=activation)
    vmem2 = _vmem_limit(4 * tm2 * fout_p * 4 + 4 * fout_p * 4, vmem_cap)
    trans = n_p * fout_p if (active and activation in ('sigmoid', 'tanh')) else 0
    out_p = pl.pallas_call(
        kernel2,
        out_shape=jax.ShapeDtypeStruct((n_p, fout_p), jnp.float32),
        grid=(nr2,),
        in_specs=[
            pl.BlockSpec((tm2, fout_p), lambda i: (i, 0)),
            pl.BlockSpec((1, fout_p), lambda i: (0, 0)),
            pl.BlockSpec((1, fout_p), lambda i: (0, 0)),
        ],
        out_specs=pl.BlockSpec((tm2, fout_p), lambda i: (i, 0)),
        compiler_params=pltpu.CompilerParams(
            dimension_semantics=("parallel",), vmem_limit_bytes=vmem2),
        cost_estimate=pl.CostEstimate(
            flops=2 * n_p * fout_p, transcendentals=trans,
            bytes_accessed=2 * n_p * fout_p * 4),
    )(y, scale.reshape(1, fout_p), shift.reshape(1, fout_p))

    return out_p[:N, :Fout]


def xavier_uniform(key, fan_in, fan_out):
    bound = (6.0 / (fan_in + fan_out)) ** 0.5
    return jax.random.uniform(key, (fan_in, fan_out), jnp.float32,
                              minval=-bound, maxval=bound)


if __name__ == "__main__":
    def make_inputs(key, n, fin, fout):
        k_feat, k_adj, k_w, k_b = jax.random.split(key, 4)
        features = jax.random.normal(k_feat, (n, fin), jnp.float32)
        raw = jax.random.uniform(k_adj, (n, n), jnp.float32)
        adjm = (raw > 0.7).astype(jnp.float32) + jnp.eye(n, dtype=jnp.float32)
        adjm = adjm / jnp.sum(adjm, axis=1, keepdims=True)   # row-normalized
        weight = xavier_uniform(k_w, fin, fout)
        bias = 0.1 * jax.random.normal(k_b, (fout,), jnp.float32)
        return features, adjm, weight, bias

    def reference(features, adjm, weight, bias, *, use_bias=True,
                  batchnorm=True, active=True, activation='relu', eps=1e-5):
        out = adjm @ (features @ weight)
        if use_bias:
            out = out + bias
        if batchnorm:
            mean = out.mean(axis=0, keepdims=True)
            var = ((out - mean) ** 2).mean(axis=0, keepdims=True)
            out = (out - mean) / jnp.sqrt(var + eps)
        if active:
            if activation == 'relu':
                out = jnp.maximum(out, 0.0)
            elif activation == 'sigmoid':
                out = jax.nn.sigmoid(out)
            elif activation == 'tanh':
                out = jnp.tanh(out)
            elif activation == 'leakyrelu':
                out = jnp.where(out >= 0.0, out, 0.2 * out)
        return out

    # Case 1: module-sized demo (N=16 nodes, 8 -> 32 features), single tile.
    f1, a1, w1, b1 = make_inputs(jax.random.PRNGKey(0), 16, 8, 32)
    out1 = jax.block_until_ready(
        gnn_layer_forward(f1, a1, w1, b1, activation='relu'))
    ref1 = reference(f1, a1, w1, b1, activation='relu')
    assert out1.shape == (16, 32)
    assert jnp.allclose(out1, ref1, atol=1e-4, rtol=1e-4), \
        float(jnp.abs(out1 - ref1).max())

    # Case 2: non-aligned N (padding + row-masked BN stats) + leakyrelu.
    f2, a2, w2, b2 = make_inputs(jax.random.PRNGKey(1), 300, 12, 40)
    out2 = jax.block_until_ready(
        gnn_layer_forward(f2, a2, w2, b2, activation='leakyrelu'))
    ref2 = reference(f2, a2, w2, b2, activation='leakyrelu')
    assert out2.shape == (300, 40)
    assert jnp.allclose(out2, ref2, atol=1e-4, rtol=1e-4), \
        float(jnp.abs(out2 - ref2).max())

    # Case 3: batchnorm disabled (bias folded into the affine pass) + sigmoid.
    f3, a3, w3, b3 = make_inputs(jax.random.PRNGKey(2), 64, 8, 16)
    out3 = jax.block_until_ready(
        gnn_layer_forward(f3, a3, w3, b3, batchnorm=False, activation='sigmoid'))
    ref3 = reference(f3, a3, w3, b3, batchnorm=False, activation='sigmoid')
    assert out3.shape == (64, 16)
    assert jnp.allclose(out3, ref3, atol=1e-4, rtol=1e-4), \
        float(jnp.abs(out3 - ref3).max())

    print("KERNEL_OK")
</pallas_src>

<mosaic_0001>
module attributes {stable_mosaic.version = 11 : i64} {
  func.func @_support_kernel(%arg0: i32, %arg1: memref<128x128xf32, #tpu.memory_space<vmem>>, %arg2: memref<128x128xf32, #tpu.memory_space<vmem>>, %arg3: memref<128x128xf32, #tpu.memory_space<vmem>>) attributes {dimension_semantics = [#tpu.dimension_semantics<parallel>], iteration_bounds = array<i64: 1>, scalar_prefetch = 0 : i64, scratch_operands = 0 : i64, tpu.core_type = #tpu.core_type<tc>, window_params = [{transform_indices = @transform_0, window_bounds = array<i64: 128, 128>}, {pipeline_mode = #tpu.pipeline_mode<synchronous>, transform_indices = @transform_1, window_bounds = array<i64: 128, 128>}, {transform_indices = @transform_2, window_bounds = array<i64: 128, 128>}]} {
    %c0 = arith.constant 0 : index
    %c0_0 = arith.constant 0 : index
    %0 = vector.load %arg1[%c0, %c0_0] : memref<128x128xf32, #tpu.memory_space<vmem>>, vector<128x128xf32>
    %c0_1 = arith.constant 0 : index
    %c0_2 = arith.constant 0 : index
    %1 = vector.load %arg2[%c0_1, %c0_2] : memref<128x128xf32, #tpu.memory_space<vmem>>, vector<128x128xf32>
    %cst = arith.constant dense<0.000000e+00> : vector<128x128xf32>
    %2 = tpu.matmul %0, %1, %cst {dimension_numbers = #tpu.dot_dimension_numbers<[1], [0], [0], [1], [0, 0, 1, 1], [], []>} : vector<128x128xf32>, vector<128x128xf32>, vector<128x128xf32> -> vector<128x128xf32>
    %c0_3 = arith.constant 0 : index
    %c0_4 = arith.constant 0 : index
    %3 = vector.load %arg3[%c0_3, %c0_4] : memref<128x128xf32, #tpu.memory_space<vmem>>, vector<128x128xf32>
    tpu.vector_store %arg3[%c0_3, %c0_4], %2 {strides = array<i32>} : memref<128x128xf32, #tpu.memory_space<vmem>>, vector<128x128xf32>,
    return
  }
  func.func @transform_0(%arg0: i32) -> (i32, i32) {
    %c0_i32 = arith.constant 0 : i32
    %c0_i32_0 = arith.constant 0 : i32
    return %arg0, %c0_i32 : i32, i32
  }
  func.func @transform_1(%arg0: i32) -> (i32, i32) {
    %c0_i32 = arith.constant 0 : i32
    %c0_i32_0 = arith.constant 0 : i32
    %c0_i32_1 = arith.constant 0 : i32
    return %c0_i32, %c0_i32_0 : i32, i32
  }
  func.func @transform_2(%arg0: i32) -> (i32, i32) {
    %c0_i32 = arith.constant 0 : i32
    %c0_i32_0 = arith.constant 0 : i32
    return %arg0, %c0_i32 : i32, i32
  }
}

</mosaic_0001>

<bundles_post_ra>
// kernel: tpu_custom_call.1
= control target key start
LH: loop header
LB: loop body
LE: loop exit
PB: predicated region body
PF: predicated region fallthrough
CT: control target
= control target key end

     0   :  { %7 = vsyncpa [#allocation3], 0  ;;  %s480_s0 = inlined_call_operand.hbm [shape: f32[128,128], index: 0, kind: input, shape index: {}]   ;;  %s481_s1 = inlined_call_operand.hbm [shape: f32[128,128], index: 1, kind: input, shape index: {}]   ;;  %s482_s2 = inlined_call_operand.hbm [shape: f32[128,128], index: 2, kind: output, shape index: {}]  }
   0x1   :  { %8 = vsyncpa [#allocation6], 0 }
   0x2   :  { %9 = vsyncpa [#allocation4], 0  ;;  %s442_s9 = smov [#allocation2]  }
   0x3   :  { %s15_s10 = sshll.u32 %s442_s9, 4  ;;  %s16_s10 = int_to_ptr.vmem [resolvable:$true] %s15_s10 }
   0x4   :  { %s384_s11 = scalar_lea.vmem %s16_s10, 2048  ;;  %p389_p1 = scmp.lt.s32.totalorder %s16_s10, %s16_s10 }
   0x5   :  { %p385_p0 = scmp.ne.s32.totalorder %s16_s10, %s384_s11  ;;  %p390_p2 = scmp.lt.s32.totalorder %s384_s11, %s384_s11 }
   0x7   :  { %p391_p3 = por %p390_p2, %p389_p1 }
   0x9   :  { %p392_p4 = pnand %p391_p3, %p385_p0 }
   0xb   :  { %395 = shalt.err (!%p392_p4)
}
   0xc   :  { %s443_s12 = smov 128   ;;  %s444_s13 = smov 8  }
   0xd   :  { %21 = dma.hbm_to_vmem [thread:$0]  %s480_s0, 2048, %s16_s10, [#allocation3], %s443_s12, %s443_s12, %s444_s13  }
   0xe   :  { %s445_s16 = smov [#allocation5]  }
   0xf   :  { %s27_s17 = sshll.u32 %s445_s16, 4  ;;  %s28_s17 = int_to_ptr.vmem [resolvable:$true] %s27_s17 }
  0x10   :  { %s404_s18 = scalar_lea.vmem %s28_s17, 2048  ;;  %p409_p6 = scmp.lt.s32.totalorder %s28_s17, %s28_s17 }
  0x11   :  { %p405_p5 = scmp.ne.s32.totalorder %s28_s17, %s404_s18  ;;  %p410_p7 = scmp.lt.s32.totalorder %s404_s18, %s404_s18 }
  0x13   :  { %p411_p8 = por %p410_p7, %p409_p6 }
  0x15   :  { %p412_p9 = pnand %p411_p8, %p405_p5 }
  0x17   :  { %415 = shalt.err (!%p412_p9)
}
  0x18   :  { %33 = dma.hbm_to_vmem [thread:$0]  %s481_s1, 2048, %s28_s17, [#allocation6], %s443_s12, %s443_s12, %s444_s13  }
  0x19   :  { %436 = dma.done.wait [#allocation3], 2048  }
  0x1a   :  { %437 = vsyncadd [#allocation3], 4294965248 }
  0x1b   :  { %438 = dma.done.wait [#allocation6], 2048  }
  0x1c   :  { %439 = vsyncadd [#allocation6], 4294965248  ;;  %v71_v0 = vld [vmem:[#allocation5 + $0x78] sm:$0xff]  ;;  %v70_v1 = vld [vmem:[#allocation5 + $0x70] sm:$0xff]  ;;  %s446_s0 = smov [#allocation7]  }
  0x1d   :  { %283 = vmatprep.subr.mxu0 %v71_v0  ;;  %339 = vmatprep.subr.mxu1 %v71_v0  ;;  %v69_v2 = vld [vmem:[#allocation5 + $0x68] sm:$0xff]  ;;  %v68_v3 = vld [vmem:[#allocation5 + $0x60] sm:$0xff]  ;;  %v67_v4 = vld [vmem:[#allocation5 + $0x58] sm:$0xff]  ;;  %s238_s1 = sshll.u32 %s446_s0, 4  ;;  %s239_s1 = int_to_ptr.vmem [resolvable:$true] %s238_s1 }
  0x1e   :  { %284 = vmatpush3.msra.mxu0 %v71_v0  ;;  %355 = vmatpush3.msra.mxu1 %v71_v0  ;;  %v66_v5 = vld [vmem:[#allocation5 + $0x50] sm:$0xff]  ;;  %v65_v6 = vld [vmem:[#allocation5 + $0x48] sm:$0xff]  ;;  %v64_v7 = vld [vmem:[#allocation5 + $0x40] sm:$0xff]  ;;  %s416_s21 = scalar_lea.vmem %s239_s1, 2048  ;;  %p421_p11 = scmp.lt.s32.totalorder %s239_s1, %s239_s1 }
  0x1f   :  { %285 = vmatprep.subr.mxu0 %v70_v1  ;;  %340 = vmatprep.subr.mxu1 %v70_v1  ;;  %v63_v8 = vld [vmem:[#allocation5 + $0x38] sm:$0xff]  ;;  %v62_v9 = vld [vmem:[#allocation5 + $0x30] sm:$0xff]  ;;  %v61_v10 = vld [vmem:[#allocation5 + $0x28] sm:$0xff]  ;;  %p417_p10 = scmp.ne.s32.totalorder %s239_s1, %s416_s21  ;;  %p422_p12 = scmp.lt.s32.totalorder %s416_s21, %s416_s21 }
  0x20   :  { %286 = vmatpush3.msra.mxu0 %v70_v1  ;;  %356 = vmatpush3.msra.mxu1 %v70_v1  ;;  %v60_v11 = vld [vmem:[#allocation5 + $0x20] sm:$0xff]  ;;  %v59_v12 = vld [vmem:[#allocation5 + $0x18] sm:$0xff]  ;;  %v58_v13 = vld [vmem:[#allocation5 + $0x10] sm:$0xff] }
  0x21   :  { %287 = vmatprep.subr.mxu0 %v69_v2  ;;  %341 = vmatprep.subr.mxu1 %v69_v2  ;;  %v57_v14 = vld [vmem:[#allocation5 + $0x8] sm:$0xff]  ;;  %v56_v15 = vld [vmem:[#allocation5] sm:$0xff]  ;;  %v42_v20 = vld [vmem:[#allocation2 + $0x10] sm:$0xff]  ;;  %p423_p13 = por %p422_p12, %p421_p11 }
  0x22   :  { %288 = vmatpush3.msra.mxu0 %v69_v2  ;;  %357 = vmatpush3.msra.mxu1 %v69_v2  ;;  %v40_v16 = vld [vmem:[#allocation2] sm:$0xff]  ;;  %v41_v18 = vld [vmem:[#allocation2 + $0x8] sm:$0xff]  ;;  %v50_v21 = vld [vmem:[#allocation2 + $0x50] sm:$0xff] }
  0x23   :  { %289 = vmatprep.subr.mxu0 %v68_v3  ;;  %342 = vmatprep.subr.mxu1 %v68_v3  ;;  %v48_v17 = vld [vmem:[#allocation2 + $0x40] sm:$0xff]  ;;  %v49_v19 = vld [vmem:[#allocation2 + $0x48] sm:$0xff]  ;;  %v43_v22 = vld [vmem:[#allocation2 + $0x18] sm:$0xff]  ;;  %p424_p0 = pnand %p423_p13, %p417_p10 }
  0x24   :  { %290 = vmatpush3.msra.mxu0 %v68_v3  ;;  %358 = vmatpush3.msra.mxu1 %v68_v3  ;;  %v51_v23 = vld [vmem:[#allocation2 + $0x58] sm:$0xff]  ;;  %v44_v24 = vld [vmem:[#allocation2 + $0x20] sm:$0xff]  ;;  %v45_v26 = vld [vmem:[#allocation2 + $0x28] sm:$0xff] }
  0x25   :  { %291 = vmatprep.subr.mxu0 %v67_v4  ;;  %343 = vmatprep.subr.mxu1 %v67_v4  ;;  %v52_v25 = vld [vmem:[#allocation2 + $0x60] sm:$0xff]  ;;  %v53_v27 = vld [vmem:[#allocation2 + $0x68] sm:$0xff]  ;;  %v46_v28 = vld [vmem:[#allocation2 + $0x30] sm:$0xff] }
  0x26   :  { %292 = vmatpush3.msra.mxu0 %v67_v4  ;;  %359 = vmatpush3.msra.mxu1 %v67_v4  ;;  %v54_v29 = vld [vmem:[#allocation2 + $0x70] sm:$0xff]  ;;  %v47_v30 = vld [vmem:[#allocation2 + $0x38] sm:$0xff] }
  0x27   :  { %293 = vmatprep.subr.mxu0 %v66_v5  ;;  %344 = vmatprep.subr.mxu1 %v66_v5  ;;  %v55_v31 = vld [vmem:[#allocation2 + $0x78] sm:$0xff] }
  0x28   :  { %294 = vmatpush3.msra.mxu0 %v66_v5  ;;  %360 = vmatpush3.msra.mxu1 %v66_v5 }
  0x29   :  { %295 = vmatprep.subr.mxu0 %v65_v6  ;;  %345 = vmatprep.subr.mxu1 %v65_v6 }
  0x2a   :  { %296 = vmatpush3.msra.mxu0 %v65_v6  ;;  %361 = vmatpush3.msra.mxu1 %v65_v6 }
  0x2b   :  { %297 = vmatprep.subr.mxu0 %v64_v7  ;;  %346 = vmatprep.subr.mxu1 %v64_v7 }
  0x2c   :  { %298 = vmatpush3.msra.mxu0 %v64_v7  ;;  %362 = vmatpush3.msra.mxu1 %v64_v7 }
  0x2d   :  { %299 = vmatprep.subr.mxu0 %v63_v8  ;;  %347 = vmatprep.subr.mxu1 %v63_v8 }
  0x2e   :  { %300 = vmatpush3.msra.mxu0 %v63_v8  ;;  %363 = vmatpush3.msra.mxu1 %v63_v8 }
  0x2f   :  { %301 = vmatprep.subr.mxu0 %v62_v9  ;;  %348 = vmatprep.subr.mxu1 %v62_v9 }
  0x30   :  { %302 = vmatpush3.msra.mxu0 %v62_v9  ;;  %364 = vmatpush3.msra.mxu1 %v62_v9 }
  0x31   :  { %303 = vmatprep.subr.mxu0 %v61_v10  ;;  %349 = vmatprep.subr.mxu1 %v61_v10 }
  0x32   :  { %304 = vmatpush3.msra.mxu0 %v61_v10  ;;  %365 = vmatpush3.msra.mxu1 %v61_v10 }
  0x33   :  { %305 = vmatprep.subr.mxu0 %v60_v11  ;;  %350 = vmatprep.subr.mxu1 %v60_v11 }
  0x34   :  { %306 = vmatpush3.msra.mxu0 %v60_v11  ;;  %366 = vmatpush3.msra.mxu1 %v60_v11 }
  0x35   :  { %307 = vmatprep.subr.mxu0 %v59_v12  ;;  %351 = vmatprep.subr.mxu1 %v59_v12 }
  0x36   :  { %308 = vmatpush3.msra.mxu0 %v59_v12  ;;  %367 = vmatpush3.msra.mxu1 %v59_v12 }
  0x37   :  { %309 = vmatprep.subr.mxu0 %v58_v13  ;;  %352 = vmatprep.subr.mxu1 %v58_v13 }
  0x38   :  { %310 = vmatpush3.msra.mxu0 %v58_v13  ;;  %368 = vmatpush3.msra.mxu1 %v58_v13 }
  0x39   :  { %311 = vmatprep.subr.mxu0 %v57_v14  ;;  %353 = vmatprep.subr.mxu1 %v57_v14 }
  0x3a   :  { %312 = vmatpush3.msra.mxu0 %v57_v14  ;;  %369 = vmatpush3.msra.mxu1 %v57_v14 }
  0x3b   :  { %313 = vmatprep.subr.mxu0 %v56_v15  ;;  %354 = vmatprep.subr.mxu1 %v56_v15 }
  0x3c   :  { %314 = vmatpush3.msra.mxu0 %v56_v15  ;;  %370 = vmatpush3.msra.mxu1 %v56_v15 }
  0x3d   :  { %315 = vmatprep.mubr.f32.mxu0 %v40_v16  ;;  %327 = vmatprep.mubr.f32.mxu1 %v48_v17 }
  0x3e   :  { %316 = vmatmul.mubr.f32.vlgmr.msra.gmra.mxu0 %v41_v18  ;;  %328 = vmatmul.mubr.f32.vlgmr.msra.gmra.mxu1 %v49_v19 }
  0x3f   :  { %318 = vmatprep.mubr.f32.mxu0 %v42_v20  ;;  %330 = vmatprep.mubr.f32.mxu1 %v50_v21 }
  0x42   :  { %319 = vmatmul.mubr.f32.gmra.mxu0 %v43_v22  ;;  %331 = vmatmul.mubr.f32.gmra.mxu1 %v51_v23 }
  0x43   :  { %321 = vmatprep.mubr.f32.mxu0 %v44_v24  ;;  %333 = vmatprep.mubr.f32.mxu1 %v52_v25 }
  0x46   :  { %322 = vmatmul.mubr.f32.gmra.mxu0 %v45_v26  ;;  %334 = vmatmul.mubr.f32.gmra.mxu1 %v53_v27 }
  0x47   :  { %324 = vmatprep.mubr.f32.mxu0 %v46_v28  ;;  %336 = vmatprep.mubr.f32.mxu1 %v54_v29 }
  0x4a   :  { %325 = vmatmul.mubr.f32.gmra.mxu0 %v47_v30  ;;  %337 = vmatmul.mubr.f32.gmra.mxu1 %v55_v31 }
  0xfe   :  { %v317_v32 = vpop.f32.mrf.mxu0  ;;  %v329_v33 = vpop.f32.mrf.mxu1 }
  0xff   :  { %218 = vst [vmem:[#allocation7 + $0x8] sm:$0xff] %v317_v32  ;;  %226 = vst [vmem:[#allocation7 + $0x48] sm:$0xff] %v329_v33 }
 0x100   :  { %v138_v34 = vpop.f32.mrf.mxu0  ;;  %v178_v35 = vpop.f32.mrf.mxu1 }
 0x101   :  { %217 = vst [vmem:[#allocation7] sm:$0xff] %v138_v34  ;;  %225 = vst [vmem:[#allocation7 + $0x40] sm:$0xff] %v178_v35 }
 0x102   :  { %v320_v36 = vpop.f32.mrf.mxu0  ;;  %v332_v37 = vpop.f32.mrf.mxu1 }
 0x103   :  { %220 = vst [vmem:[#allocation7 + $0x18] sm:$0xff] %v320_v36  ;;  %228 = vst [vmem:[#allocation7 + $0x58] sm:$0xff] %v332_v37 }
 0x104   :  { %v148_v38 = vpop.f32.mrf.mxu0  ;;  %v188_v39 = vpop.f32.mrf.mxu1 }
 0x105   :  { %219 = vst [vmem:[#allocation7 + $0x10] sm:$0xff] %v148_v38  ;;  %227 = vst [vmem:[#allocation7 + $0x50] sm:$0xff] %v188_v39 }
 0x106   :  { %v323_v40 = vpop.f32.mrf.mxu0  ;;  %v335_v41 = vpop.f32.mrf.mxu1 }
 0x107   :  { %222 = vst [vmem:[#allocation7 + $0x28] sm:$0xff] %v323_v40  ;;  %230 = vst [vmem:[#allocation7 + $0x68] sm:$0xff] %v335_v41 }
 0x108   :  { %v158_v42 = vpop.f32.mrf.mxu0  ;;  %v198_v43 = vpop.f32.mrf.mxu1 }
 0x109   :  { %221 = vst [vmem:[#allocation7 + $0x20] sm:$0xff] %v158_v42  ;;  %229 = vst [vmem:[#allocation7 + $0x60] sm:$0xff] %v198_v43 }
 0x10a   :  { %v326_v44 = vpop.f32.mrf.mxu0  ;;  %v338_v45 = vpop.f32.mrf.mxu1 }
 0x10b   :  { %224 = vst [vmem:[#allocation7 + $0x38] sm:$0xff] %v326_v44  ;;  %232 = vst [vmem:[#allocation7 + $0x78] sm:$0xff] %v338_v45 }
 0x10c   :  { %v168_v46 = vpop.f32.mrf.mxu0  ;;  %v208_v47 = vpop.f32.mrf.mxu1 }
 0x10d   :  { %223 = vst [vmem:[#allocation7 + $0x30] sm:$0xff] %v168_v46  ;;  %231 = vst [vmem:[#allocation7 + $0x70] sm:$0xff] %v208_v47 }
 0x10e   :  { %427 = shalt.err (!%p424_p0)
}
 0x10f   :  { %244 = dma.vmem_to_hbm [thread:$0]  %s239_s1, 2048, %s482_s2, [#allocation4], %s443_s12, %s443_s12, %s444_s13  }
 0x110   :  { %440 = dma.done.wait [#allocation4], 2048  }
 0x111   :  { %441 = vsyncadd [#allocation4], 4294965248 }
 0x112   :  { %248 = vsyncpa [#allocation3], 1 }
 0x113   :  { %249 = vsyncpa [#allocation6], 1 }
 0x114   :  { %250 = vsyncpa [#allocation4], 1 }

</bundles_post_ra>
